<compile_context>
chip_gen: v7x
topology: tpu7x:2x2x1
jax: 0.10.0
libtpu: 0.0.40
codegen_flags: <defaults>
</compile_context>

<pallas_src>
import functools

import jax
import jax.numpy as jnp
from jax.experimental import pallas as pl
from jax.experimental.pallas import tpu as pltpu

GN_EPS = 1e-5   # torch_geometric GraphNorm default eps


def _round_up(v, m):
    return ((v + m - 1) // m) * m


# --------------------------------- kernel -------------------------------------
def _sage_encoder_kernel(x_ref, adj_ref, wl_ref, wr_ref, b_ref,
                         gnw_ref, gnb_ref, gnms_ref,
                         out_ref,
                         h_mm, h_nxt, s_sum, s_sq,
                         *, num_layers, tile_m, n_valid, n_pad, mm_dtype):
    l = pl.program_id(0)          # layer index      (slow axis)
    i = pl.program_id(1)          # node row tile    (fast axis)
    last = num_layers - 1
    inv_n = 1.0 / float(n_valid)
    needs_row_mask = (n_pad != n_valid)     # static -> masking compiles out if false

    # ---- per-layer prologue: runs once per layer, at the first row tile ------
    @pl.when(i == 0)
    def _prologue():
        @pl.when(l == 0)
        def _():
            h_mm[...] = x_ref[...]          # x already in matmul dtype

        @pl.when(l > 0)
        def _():
            # Finalize GraphNorm of the previous layer's ReLU output (h_nxt).
            #   centered = a - mean * mean_scale
            #   var      = E[a^2] - (2*ms - ms^2) * mean^2   (stats over valid nodes)
            # Folded into a single per-column (scale, shift) FMA pass.
            mean = s_sum[...] * inv_n                        # (1, Hp)
            ex2 = s_sq[...] * inv_n                          # (1, Hp)
            ms = gnms_ref[...]
            var = jnp.maximum(ex2 - (2.0 * ms - ms * ms) * mean * mean, 0.0)
            scale = gnw_ref[...] * jax.lax.rsqrt(var + GN_EPS)
            shift = gnb_ref[...] - mean * ms * scale
            h_mm[...] = (h_nxt[...] * scale + shift).astype(mm_dtype)

        s_sum[...] = jnp.zeros_like(s_sum)
        s_sq[...] = jnp.zeros_like(s_sq)

    # ---- SAGEConv on this row tile --------------------------------------------
    row0 = pl.multiple_of(i * tile_m, tile_m)
    hm = h_mm[...]                                           # (Np, Hp) mm_dtype, resident
    self_mm = h_mm[pl.ds(row0, tile_m), :]                   # (tm, Hp) mm_dtype

    # mean aggregation: row-normalized adjacency tile @ h   -> (tm, Hp) f32
    agg = jnp.dot(adj_ref[...], hm, preferred_element_type=jnp.float32)

    # lin_l(agg) + lin_r(self) + bias  (two K=Hp MXU passes, no concat copy)
    raw = (jnp.dot(agg.astype(mm_dtype), wl_ref[0],
                   preferred_element_type=jnp.float32)
           + jnp.dot(self_mm, wr_ref[0], preferred_element_type=jnp.float32)
           + b_ref[0])

    if needs_row_mask:
        rows = row0 + jax.lax.broadcasted_iota(jnp.int32, (tile_m, 1), 0)
        valid = rows < n_valid

    @pl.when(l < last)
    def _intermediate():
        a = jnp.maximum(raw, 0.0)                            # ReLU (+ dropout = id)
        if needs_row_mask:
            a = jnp.where(valid, a, 0.0)                     # keep padded rows out of stats
        h_nxt[pl.ds(row0, tile_m), :] = a
        s_sum[...] = s_sum[...] + jnp.sum(a, axis=0, keepdims=True)
        s_sq[...] = s_sq[...] + jnp.sum(a * a, axis=0, keepdims=True)

    @pl.when(l == last)
    def _final():
        res = raw
        if needs_row_mask:
            res = jnp.where(valid, res, 0.0)
        out_ref[...] = res.astype(out_ref.dtype)


# --------------------------------- wrapper ------------------------------------
def sage_encoder_forward(x, adj, params, *, num_layers, tile_m=128,
                         matmul_dtype=jnp.float32):
    """x: [N, H] node features, adj: [N, N] row-normalized dense adjacency."""
    num_layers = max(2, num_layers)            # module clamps num_layers to >= 2
    n, h = x.shape
    f32 = jnp.float32

    hp = max(_round_up(h, 128), 128)           # lane-dense feature dim
    tile_m = max(8, (min(tile_m, _round_up(n, 8)) // 8) * 8)
    n_pad = _round_up(n, tile_m)
    n_tiles = n_pad // tile_m
    last = num_layers - 1

    # ---- pad / pre-pack operands (zero padding is exact, see kernel header) ---
    x_p = jnp.pad(x.astype(f32), ((0, n_pad - n), (0, hp - h))).astype(matmul_dtype)
    adj_p = jnp.pad(adj.astype(f32), ((0, n_pad - n), (0, n_pad - n))).astype(matmul_dtype)

    wl_p = jnp.pad(params["wl"].astype(f32),
                   ((0, 0), (0, hp - h), (0, hp - h))).astype(matmul_dtype)
    wr_p = jnp.pad(params["wr"].astype(f32),
                   ((0, 0), (0, hp - h), (0, hp - h))).astype(matmul_dtype)
    b_p = jnp.pad(params["bl"].astype(f32), ((0, 0), (0, 0), (0, hp - h)))
    gn_w = jnp.pad(params["gn_w"].astype(f32), ((0, 0), (0, hp - h)))
    gn_b = jnp.pad(params["gn_b"].astype(f32), ((0, 0), (0, hp - h)))
    gn_ms = jnp.pad(params["gn_ms"].astype(f32), ((0, 0), (0, hp - h)))

    kernel = functools.partial(_sage_encoder_kernel, num_layers=num_layers,
                               tile_m=tile_m, n_valid=n, n_pad=n_pad,
                               mm_dtype=matmul_dtype)

    itemsize = jnp.dtype(matmul_dtype).itemsize
    flops = num_layers * (2 * n_pad * n_pad * hp + 4 * n_pad * hp * hp)
    bytes_accessed = (num_layers * n_pad * n_pad * itemsize      # adjacency streamed per layer
                      + num_layers * 2 * hp * hp * itemsize      # per-layer weights
                      + n_pad * hp * (itemsize + 4))             # x in + out
    cost = pl.CostEstimate(flops=int(flops),
                           transcendentals=int((num_layers - 1) * hp),
                           bytes_accessed=int(bytes_accessed))

    # Output blocks: intermediate layers collapse onto block 0 (never written in
    # the kernel), so each output row tile is flushed to HBM exactly once, at
    # the last layer.
    def out_index(l, i):
        return (jnp.where(l == last, i, 0), 0)

    grid_spec = pltpu.PrefetchScalarGridSpec(
        num_scalar_prefetch=0,
        grid=(num_layers, n_tiles),
        in_specs=[
            pl.BlockSpec((n_pad, hp), lambda l, i: (0, 0)),          # x (resident)
            pl.BlockSpec((tile_m, n_pad), lambda l, i: (i, 0)),      # adjacency row tile
            pl.BlockSpec((1, hp, hp), lambda l, i: (l, 0, 0)),       # Wl per layer
            pl.BlockSpec((1, hp, hp), lambda l, i: (l, 0, 0)),       # Wr per layer
            pl.BlockSpec((1, 1, hp), lambda l, i: (l, 0, 0)),        # bias per layer
            pl.BlockSpec((1, hp), lambda l, i: (0, 0)),              # GraphNorm weight
            pl.BlockSpec((1, hp), lambda l, i: (0, 0)),              # GraphNorm bias
            pl.BlockSpec((1, hp), lambda l, i: (0, 0)),              # GraphNorm mean_scale
        ],
        out_specs=pl.BlockSpec((tile_m, hp), out_index),
        scratch_shapes=[
            pltpu.VMEM((n_pad, hp), matmul_dtype),   # h_mm  (layer input, matmul operand form)
            pltpu.VMEM((n_pad, hp), jnp.float32),    # h_nxt (pre-norm activations, f32)
            pltpu.VMEM((1, hp), jnp.float32),        # GraphNorm running sum
            pltpu.VMEM((1, hp), jnp.float32),        # GraphNorm running sum of squares
        ],
    )

    scratch_bytes = n_pad * hp * (itemsize + 4) + 2 * hp * 4
    stream_bytes = 2 * (n_pad * hp * itemsize            # x
                        + tile_m * n_pad * itemsize      # adjacency tile
                        + 2 * hp * hp * itemsize         # Wl + Wr
                        + 4 * hp * 4                     # bias + GN params
                        + tile_m * hp * 4)               # out tile
    vmem_limit = int(min(max(2 * (scratch_bytes + stream_bytes), 32 * 1024 * 1024),
                         48 * 1024 * 1024))

    out = pl.pallas_call(
        kernel,
        out_shape=jax.ShapeDtypeStruct((n_pad, hp), jnp.float32),
        grid_spec=grid_spec,
        compiler_params=pltpu.CompilerParams(
            # Both axes carry resident-scratch dependencies -> "arbitrary".
            dimension_semantics=("arbitrary", "arbitrary"),
            vmem_limit_bytes=vmem_limit,
        ),
        cost_estimate=cost,
    )(x_p, adj_p, wl_p, wr_p, b_p, gn_w, gn_b, gn_ms)

    return out[:n, :h]


# ----------------------------- pure-JAX reference -----------------------------
def sage_encoder_reference(x, adj, params, *, num_layers, matmul_dtype=jnp.float32):
    md = matmul_dtype

    def mm(a, b):
        return jnp.dot(a.astype(md), b.astype(md), preferred_element_type=jnp.float32)

    num_layers = max(2, num_layers)
    h = x.astype(jnp.float32)
    for l in range(num_layers):
        agg = mm(adj, h)
        out = mm(agg, params["wl"][l]) + params["bl"][l] + mm(h, params["wr"][l])
        if l < num_layers - 1:
            out = jnp.maximum(out, 0.0)
            mean = out.mean(0, keepdims=True)
            cen = out - mean * params["gn_ms"]
            var = (cen * cen).mean(0, keepdims=True)
            out = params["gn_w"] * cen / jnp.sqrt(var + GN_EPS) + params["gn_b"]
        h = out
    return h


# ------------------------------- glue / setup ---------------------------------
def build_mean_adjacency(edge_index, num_nodes):
    """Row-normalized dense adjacency: row=dst, col=src, rows sum to 1 (or 0)."""
    src, dst = edge_index[0], edge_index[1]
    adj = jnp.zeros((num_nodes, num_nodes), jnp.float32).at[dst, src].add(1.0)
    deg = adj.sum(axis=1, keepdims=True)
    return adj / jnp.maximum(deg, 1.0)


def init_params(key, hidden, num_layers):
    """PyTorch-style uniform init for the SAGEConv linears ([in, out] layout)."""
    num_layers = max(2, num_layers)
    ks = jax.random.split(key, 6)
    bound = 1.0 / (hidden ** 0.5)

    def lin(k, shape):
        return jax.random.uniform(k, shape, jnp.float32, -bound, bound)

    return {
        "wl": lin(ks[0], (num_layers, hidden, hidden)),   # lin_l weight (with bias)
        "bl": lin(ks[1], (num_layers, 1, hidden)),
        "wr": lin(ks[2], (num_layers, hidden, hidden)),   # lin_r weight (no bias)
        # GraphNorm defaults are weight=1, bias=0, mean_scale=1; perturb slightly
        # so the affine / mean_scale math is actually exercised by the check.
        "gn_w": 1.0 + 0.1 * jax.random.uniform(ks[3], (1, hidden), jnp.float32, -1, 1),
        "gn_b": 0.1 * jax.random.uniform(ks[4], (1, hidden), jnp.float32, -1, 1),
        "gn_ms": 1.0 + 0.1 * jax.random.uniform(ks[5], (1, hidden), jnp.float32, -1, 1),
    }


if __name__ == "__main__":
    N_NODES, HIDDEN, NUM_LAYERS, N_EDGES = 16, 32, 3, 48

    key = jax.random.PRNGKey(0)
    k_x, k_e, k_p = jax.random.split(key, 3)

    x = jax.random.normal(k_x, (N_NODES, HIDDEN), jnp.float32)
    edge_index = jax.random.randint(k_e, (2, N_EDGES), 0, N_NODES)
    adj = build_mean_adjacency(edge_index, N_NODES)
    params = init_params(k_p, HIDDEN, NUM_LAYERS)

    # f32 path: strict check against the pure-JAX reference (tile_m=8 -> 2 row tiles).
    out = sage_encoder_forward(x, adj, params, num_layers=NUM_LAYERS, tile_m=8)
    out = jax.block_until_ready(out)
    ref = sage_encoder_reference(x, adj, params, num_layers=NUM_LAYERS)
    assert out.shape == (N_NODES, HIDDEN)
    err = float(jnp.abs(out - ref).max())
    assert jnp.allclose(out, ref, atol=5e-4, rtol=5e-4), err

    # bf16-operand / f32-accumulate path (v6e/v7x MXU native), checked against a
    # reference that quantizes the matmul operands identically.
    out_bf = sage_encoder_forward(x, adj, params, num_layers=NUM_LAYERS, tile_m=8,
                                  matmul_dtype=jnp.bfloat16)
    out_bf = jax.block_until_ready(out_bf)
    ref_bf = sage_encoder_reference(x, adj, params, num_layers=NUM_LAYERS,
                                    matmul_dtype=jnp.bfloat16)
    err_bf = float(jnp.abs(out_bf - ref_bf).max())
    assert jnp.allclose(out_bf, ref_bf, atol=2e-3, rtol=2e-3), err_bf

    print("KERNEL_OK")
</pallas_src>

<mosaic_0001>
module attributes {stable_mosaic.version = 11 : i64} {
  func.func @_sage_encoder_kernel(%arg0: i32, %arg1: i32, %arg2: memref<16x128xf32, #tpu.memory_space<vmem>>, %arg3: memref<8x16xf32, #tpu.memory_space<vmem>>, %arg4: memref<1x128x128xf32, #tpu.memory_space<vmem>>, %arg5: memref<1x128x128xf32, #tpu.memory_space<vmem>>, %arg6: memref<1x1x128xf32, #tpu.memory_space<vmem>>, %arg7: memref<1x128xf32, #tpu.memory_space<vmem>>, %arg8: memref<1x128xf32, #tpu.memory_space<vmem>>, %arg9: memref<1x128xf32, #tpu.memory_space<vmem>>, %arg10: memref<8x128xf32, #tpu.memory_space<vmem>>, %arg11: memref<16x128xf32, #tpu.memory_space<vmem>>, %arg12: memref<16x128xf32, #tpu.memory_space<vmem>>, %arg13: memref<1x128xf32, #tpu.memory_space<vmem>>, %arg14: memref<1x128xf32, #tpu.memory_space<vmem>>) attributes {dimension_semantics = [#tpu.dimension_semantics<arbitrary>, #tpu.dimension_semantics<arbitrary>], iteration_bounds = array<i64: 3, 2>, scalar_prefetch = 0 : i64, scratch_operands = 4 : i64, tpu.core_type = #tpu.core_type<tc>, window_params = [{pipeline_mode = #tpu.pipeline_mode<synchronous>, transform_indices = @transform_0, window_bounds = array<i64: 16, 128>}, {transform_indices = @transform_1, window_bounds = array<i64: 8, 16>}, {transform_indices = @transform_2, window_bounds = array<i64: 1, 128, 128>}, {transform_indices = @transform_3, window_bounds = array<i64: 1, 128, 128>}, {transform_indices = @transform_4, window_bounds = array<i64: 1, 1, 128>}, {pipeline_mode = #tpu.pipeline_mode<synchronous>, transform_indices = @transform_5, window_bounds = array<i64: 1, 128>}, {pipeline_mode = #tpu.pipeline_mode<synchronous>, transform_indices = @transform_6, window_bounds = array<i64: 1, 128>}, {pipeline_mode = #tpu.pipeline_mode<synchronous>, transform_indices = @transform_7, window_bounds = array<i64: 1, 128>}, {transform_indices = @transform_8, window_bounds = array<i64: 8, 128>}]} {
    %c0_i32 = arith.constant 0 : i32
    %0 = arith.cmpi eq, %arg1, %c0_i32 : i32
    %1 = arith.extui %0 : i1 to i32
    %c0_i32_0 = arith.constant 0 : i32
    %2 = arith.cmpi ne, %1, %c0_i32_0 : i32
    scf.if %2 {
      %c0_i32_19 = arith.constant 0 : i32
      %27 = arith.cmpi eq, %arg0, %c0_i32_19 : i32
      %28 = arith.extui %27 : i1 to i32
      %c0_i32_20 = arith.constant 0 : i32
      %29 = arith.cmpi ne, %28, %c0_i32_20 : i32
      scf.if %29 {
        %c0_29 = arith.constant 0 : index
        %c0_30 = arith.constant 0 : index
        %37 = vector.load %arg2[%c0_29, %c0_30] : memref<16x128xf32, #tpu.memory_space<vmem>>, vector<16x128xf32>
        %c0_31 = arith.constant 0 : index
        %c0_32 = arith.constant 0 : index
        %38 = vector.load %arg11[%c0_31, %c0_32] : memref<16x128xf32, #tpu.memory_space<vmem>>, vector<16x128xf32>
        tpu.vector_store %arg11[%c0_31, %c0_32], %37 {strides = array<i32>} : memref<16x128xf32, #tpu.memory_space<vmem>>, vector<16x128xf32>,
      } else {
      }
      %c0_i32_21 = arith.constant 0 : i32
      %30 = arith.cmpi sgt, %arg0, %c0_i32_21 : i32
      %31 = arith.extui %30 : i1 to i32
      %c0_i32_22 = arith.constant 0 : i32
      %32 = arith.cmpi ne, %31, %c0_i32_22 : i32
      scf.if %32 {
        %c0_29 = arith.constant 0 : index
        %c0_30 = arith.constant 0 : index
        %37 = vector.load %arg13[%c0_29, %c0_30] : memref<1x128xf32, #tpu.memory_space<vmem>>, vector<1x128xf32>
        %cst_31 = arith.constant 6.250000e-02 : f32
        %38 = vector.broadcast %cst_31 : f32 to vector<1x128xf32>
        %39 = arith.mulf %37, %38 : vector<1x128xf32>
        %c0_32 = arith.constant 0 : index
        %c0_33 = arith.constant 0 : index
        %40 = vector.load %arg14[%c0_32, %c0_33] : memref<1x128xf32, #tpu.memory_space<vmem>>, vector<1x128xf32>
        %cst_34 = arith.constant 6.250000e-02 : f32
        %41 = vector.broadcast %cst_34 : f32 to vector<1x128xf32>
        %42 = arith.mulf %40, %41 : vector<1x128xf32>
        %c0_35 = arith.constant 0 : index
        %c0_36 = arith.constant 0 : index
        %43 = vector.load %arg9[%c0_35, %c0_36] : memref<1x128xf32, #tpu.memory_space<vmem>>, vector<1x128xf32>
        %cst_37 = arith.constant 2.000000e+00 : f32
        %44 = vector.broadcast %cst_37 : f32 to vector<1x128xf32>
        %45 = arith.mulf %44, %43 : vector<1x128xf32>
        %46 = arith.mulf %43, %43 : vector<1x128xf32>
        %47 = arith.subf %45, %46 : vector<1x128xf32>
        %48 = arith.mulf %47, %39 : vector<1x128xf32>
        %49 = arith.mulf %48, %39 : vector<1x128xf32>
        %50 = arith.subf %42, %49 : vector<1x128xf32>
        %cst_38 = arith.constant 0.000000e+00 : f32
        %51 = vector.broadcast %cst_38 : f32 to vector<1x128xf32>
        %52 = arith.maximumf %50, %51 : vector<1x128xf32>
        %c0_39 = arith.constant 0 : index
        %c0_40 = arith.constant 0 : index
        %53 = vector.load %arg7[%c0_39, %c0_40] : memref<1x128xf32, #tpu.memory_space<vmem>>, vector<1x128xf32>
        %cst_41 = arith.constant 9.99999974E-6 : f32
        %54 = vector.broadcast %cst_41 : f32 to vector<1x128xf32>
        %55 = arith.addf %52, %54 : vector<1x128xf32>
        %56 = math.rsqrt %55 : vector<1x128xf32>
        %57 = arith.mulf %53, %56 : vector<1x128xf32>
        %c0_42 = arith.constant 0 : index
        %c0_43 = arith.constant 0 : index
        %58 = vector.load %arg8[%c0_42, %c0_43] : memref<1x128xf32, #tpu.memory_space<vmem>>, vector<1x128xf32>
        %59 = arith.mulf %39, %43 : vector<1x128xf32>
        %60 = arith.mulf %59, %57 : vector<1x128xf32>
        %61 = arith.subf %58, %60 : vector<1x128xf32>
        %c0_44 = arith.constant 0 : index
        %c0_45 = arith.constant 0 : index
        %62 = vector.load %arg12[%c0_44, %c0_45] : memref<16x128xf32, #tpu.memory_space<vmem>>, vector<16x128xf32>
        %63 = vector.broadcast %57 : vector<1x128xf32> to vector<16x128xf32>
        %64 = arith.mulf %62, %63 : vector<16x128xf32>
        %65 = vector.broadcast %61 : vector<1x128xf32> to vector<16x128xf32>
        %66 = arith.addf %64, %65 : vector<16x128xf32>
        %c0_46 = arith.constant 0 : index
        %c0_47 = arith.constant 0 : index
        %67 = vector.load %arg11[%c0_46, %c0_47] : memref<16x128xf32, #tpu.memory_space<vmem>>, vector<16x128xf32>
        tpu.vector_store %arg11[%c0_46, %c0_47], %66 {strides = array<i32>} : memref<16x128xf32, #tpu.memory_space<vmem>>, vector<16x128xf32>,
      } else {
      }
      %cst_23 = arith.constant 0.000000e+00 : f32
      %33 = vector.broadcast %cst_23 : f32 to vector<1x128xf32>
      %c0_24 = arith.constant 0 : index
      %c0_25 = arith.constant 0 : index
      %34 = vector.load %arg13[%c0_24, %c0_25] : memref<1x128xf32, #tpu.memory_space<vmem>>, vector<1x128xf32>
      tpu.vector_store %arg13[%c0_24, %c0_25], %33 {strides = array<i32>} : memref<1x128xf32, #tpu.memory_space<vmem>>, vector<1x128xf32>,
      %cst_26 = arith.constant 0.000000e+00 : f32
      %35 = vector.broadcast %cst_26 : f32 to vector<1x128xf32>
      %c0_27 = arith.constant 0 : index
      %c0_28 = arith.constant 0 : index
      %36 = vector.load %arg14[%c0_27, %c0_28] : memref<1x128xf32, #tpu.memory_space<vmem>>, vector<1x128xf32>
      tpu.vector_store %arg14[%c0_27, %c0_28], %35 {strides = array<i32>} : memref<1x128xf32, #tpu.memory_space<vmem>>, vector<1x128xf32>,
    } else {
    }
    %c8_i32 = arith.constant 8 : i32
    %3 = arith.muli %arg1, %c8_i32 : i32
    %4 = tpu.assume_multiple %3, 8 : i32
    %c0 = arith.constant 0 : index
    %c0_1 = arith.constant 0 : index
    %5 = vector.load %arg11[%c0, %c0_1] : memref<16x128xf32, #tpu.memory_space<vmem>>, vector<16x128xf32>
    %6 = arith.index_cast %4 : i32 to index
    %c0_2 = arith.constant 0 : index
    %7 = vector.load %arg11[%6, %c0_2] : memref<16x128xf32, #tpu.memory_space<vmem>>, vector<8x128xf32>
    %c0_3 = arith.constant 0 : index
    %c0_4 = arith.constant 0 : index
    %8 = vector.load %arg3[%c0_3, %c0_4] : memref<8x16xf32, #tpu.memory_space<vmem>>, vector<8x16xf32>
    %cst = arith.constant dense<0.000000e+00> : vector<8x128xf32>
    %9 = tpu.matmul %8, %5, %cst {dimension_numbers = #tpu.dot_dimension_numbers<[1], [0], [0], [1], [0, 0, 1, 1], [], []>} : vector<8x16xf32>, vector<16x128xf32>, vector<8x128xf32> -> vector<8x128xf32>
    %c0_5 = arith.constant 0 : index
    %c0_6 = arith.constant 0 : index
    %c0_7 = arith.constant 0 : index
    %10 = vector.load %arg4[%c0_5, %c0_6, %c0_7] : memref<1x128x128xf32, #tpu.memory_space<vmem>>, vector<1x128x128xf32>
    %11 = vector.shape_cast %10 : vector<1x128x128xf32> to vector<128x128xf32>
    %cst_8 = arith.constant dense<0.000000e+00> : vector<8x128xf32>
    %12 = tpu.matmul %9, %11, %cst_8 {dimension_numbers = #tpu.dot_dimension_numbers<[1], [0], [0], [1], [0, 0, 1, 1], [], []>} : vector<8x128xf32>, vector<128x128xf32>, vector<8x128xf32> -> vector<8x128xf32>
    %c0_9 = arith.constant 0 : index
    %c0_10 = arith.constant 0 : index
    %c0_11 = arith.constant 0 : index
    %13 = vector.load %arg5[%c0_9, %c0_10, %c0_11] : memref<1x128x128xf32, #tpu.memory_space<vmem>>, vector<1x128x128xf32>
    %14 = vector.shape_cast %13 : vector<1x128x128xf32> to vector<128x128xf32>
    %cst_12 = arith.constant dense<0.000000e+00> : vector<8x128xf32>
    %15 = tpu.matmul %7, %14, %cst_12 {dimension_numbers = #tpu.dot_dimension_numbers<[1], [0], [0], [1], [0, 0, 1, 1], [], []>} : vector<8x128xf32>, vector<128x128xf32>, vector<8x128xf32> -> vector<8x128xf32>
    %16 = arith.addf %12, %15 : vector<8x128xf32>
    %c0_13 = arith.constant 0 : index
    %c0_14 = arith.constant 0 : index
    %c0_15 = arith.constant 0 : index
    %17 = vector.load %arg6[%c0_13, %c0_14, %c0_15] : memref<1x1x128xf32, #tpu.memory_space<vmem>>, vector<1x1x128xf32>
    %18 = vector.shape_cast %17 : vector<1x1x128xf32> to vector<1x128xf32>
    %19 = vector.broadcast %18 : vector<1x128xf32> to vector<8x128xf32>
    %20 = arith.addf %16, %19 : vector<8x128xf32>
    %c2_i32 = arith.constant 2 : i32
    %21 = arith.cmpi slt, %arg0, %c2_i32 : i32
    %22 = arith.extui %21 : i1 to i32
    %c0_i32_16 = arith.constant 0 : i32
    %23 = arith.cmpi ne, %22, %c0_i32_16 : i32
    scf.if %23 {
      %cst_19 = arith.constant 0.000000e+00 : f32
      %27 = vector.broadcast %cst_19 : f32 to vector<8x128xf32>
      %28 = arith.maximumf %20, %27 : vector<8x128xf32>
      %29 = arith.index_cast %4 : i32 to index
      %c0_20 = arith.constant 0 : index
      %30 = vector.load %arg12[%29, %c0_20] : memref<16x128xf32, #tpu.memory_space<vmem>>, vector<8x128xf32>
      tpu.vector_store %arg12[%29, %c0_20], %28 {strides = array<i32>} : memref<16x128xf32, #tpu.memory_space<vmem>>, vector<8x128xf32>,
      %c0_21 = arith.constant 0 : index
      %c0_22 = arith.constant 0 : index
      %31 = vector.load %arg13[%c0_21, %c0_22] : memref<1x128xf32, #tpu.memory_space<vmem>>, vector<1x128xf32>
      %cst_23 = arith.constant dense<0.000000e+00> : vector<128xf32>
      %32 = vector.multi_reduction <add>, %28, %cst_23 [0] : vector<8x128xf32> to vector<128xf32>
      %33 = vector.shape_cast %32 : vector<128xf32> to vector<1x128xf32>
      %34 = arith.addf %31, %33 : vector<1x128xf32>
      %c0_24 = arith.constant 0 : index
      %c0_25 = arith.constant 0 : index
      %35 = vector.load %arg13[%c0_24, %c0_25] : memref<1x128xf32, #tpu.memory_space<vmem>>, vector<1x128xf32>
      tpu.vector_store %arg13[%c0_24, %c0_25], %34 {strides = array<i32>} : memref<1x128xf32, #tpu.memory_space<vmem>>, vector<1x128xf32>,
      %c0_26 = arith.constant 0 : index
      %c0_27 = arith.constant 0 : index
      %36 = vector.load %arg14[%c0_26, %c0_27] : memref<1x128xf32, #tpu.memory_space<vmem>>, vector<1x128xf32>
      %37 = arith.mulf %28, %28 : vector<8x128xf32>
      %cst_28 = arith.constant dense<0.000000e+00> : vector<128xf32>
      %38 = vector.multi_reduction <add>, %37, %cst_28 [0] : vector<8x128xf32> to vector<128xf32>
      %39 = vector.shape_cast %38 : vector<128xf32> to vector<1x128xf32>
      %40 = arith.addf %36, %39 : vector<1x128xf32>
      %c0_29 = arith.constant 0 : index
      %c0_30 = arith.constant 0 : index
      %41 = vector.load %arg14[%c0_29, %c0_30] : memref<1x128xf32, #tpu.memory_space<vmem>>, vector<1x128xf32>
      tpu.vector_store %arg14[%c0_29, %c0_30], %40 {strides = array<i32>} : memref<1x128xf32, #tpu.memory_space<vmem>>, vector<1x128xf32>,
    } else {
    }
    %c2_i32_17 = arith.constant 2 : i32
    %24 = arith.cmpi eq, %arg0, %c2_i32_17 : i32
    %25 = arith.extui %24 : i1 to i32
    %c0_i32_18 = arith.constant 0 : i32
    %26 = arith.cmpi ne, %25, %c0_i32_18 : i32
    scf.if %26 {
      %c0_19 = arith.constant 0 : index
      %c0_20 = arith.constant 0 : index
      %27 = vector.load %arg10[%c0_19, %c0_20] : memref<8x128xf32, #tpu.memory_space<vmem>>, vector<8x128xf32>
      tpu.vector_store %arg10[%c0_19, %c0_20], %20 {strides = array<i32>} : memref<8x128xf32, #tpu.memory_space<vmem>>, vector<8x128xf32>,
    } else {
    }
    return
  }
  func.func @transform_0(%arg0: i32, %arg1: i32) -> (i32, i32) {
    %c0_i32 = arith.constant 0 : i32
    %c0_i32_0 = arith.constant 0 : i32
    %c0_i32_1 = arith.constant 0 : i32
    return %c0_i32, %c0_i32_0 : i32, i32
  }
  func.func @transform_1(%arg0: i32, %arg1: i32) -> (i32, i32) {
    %c0_i32 = arith.constant 0 : i32
    %c0_i32_0 = arith.constant 0 : i32
    return %arg1, %c0_i32 : i32, i32
  }
  func.func @transform_2(%arg0: i32, %arg1: i32) -> (i32, i32, i32) {
    %c0_i32 = arith.constant 0 : i32
    %c0_i32_0 = arith.constant 0 : i32
    %c0_i32_1 = arith.constant 0 : i32
    return %arg0, %c0_i32, %c0_i32_0 : i32, i32, i32
  }
  func.func @transform_3(%arg0: i32, %arg1: i32) -> (i32, i32, i32) {
    %c0_i32 = arith.constant 0 : i32
    %c0_i32_0 = arith.constant 0 : i32
    %c0_i32_1 = arith.constant 0 : i32
    return %arg0, %c0_i32, %c0_i32_0 : i32, i32, i32
  }
  func.func @transform_4(%arg0: i32, %arg1: i32) -> (i32, i32, i32) {
    %c0_i32 = arith.constant 0 : i32
    %c0_i32_0 = arith.constant 0 : i32
    %c0_i32_1 = arith.constant 0 : i32
    return %arg0, %c0_i32, %c0_i32_0 : i32, i32, i32
  }
  func.func @transform_5(%arg0: i32, %arg1: i32) -> (i32, i32) {
    %c0_i32 = arith.constant 0 : i32
    %c0_i32_0 = arith.constant 0 : i32
    %c0_i32_1 = arith.constant 0 : i32
    return %c0_i32, %c0_i32_0 : i32, i32
  }
  func.func @transform_6(%arg0: i32, %arg1: i32) -> (i32, i32) {
    %c0_i32 = arith.constant 0 : i32
    %c0_i32_0 = arith.constant 0 : i32
    %c0_i32_1 = arith.constant 0 : i32
    return %c0_i32, %c0_i32_0 : i32, i32
  }
  func.func @transform_7(%arg0: i32, %arg1: i32) -> (i32, i32) {
    %c0_i32 = arith.constant 0 : i32
    %c0_i32_0 = arith.constant 0 : i32
    %c0_i32_1 = arith.constant 0 : i32
    return %c0_i32, %c0_i32_0 : i32, i32
  }
  func.func @transform_8(%arg0: i32, %arg1: i32) -> (i32, i32) {
    %c2_i32 = arith.constant 2 : i32
    %0 = arith.cmpi eq, %arg0, %c2_i32 : i32
    %c0_i32 = arith.constant 0 : i32
    %1 = arith.select %0, %arg1, %c0_i32 : i32
    %c0_i32_0 = arith.constant 0 : i32
    %c0_i32_1 = arith.constant 0 : i32
    return %1, %c0_i32_0 : i32, i32
  }
}

</mosaic_0001>

<bundles_post_ra>
// kernel: tpu_custom_call.1
= control target key start
LH: loop header
LB: loop body
LE: loop exit
PB: predicated region body
PF: predicated region fallthrough
CT: control target
= control target key end

     0   :  { %s2178_s0 = inlined_call_operand.hbm [shape: f32[16,128], index: 0, kind: input, shape index: {}]   ;;  %s2179_s1 = inlined_call_operand.hbm [shape: f32[16,16], index: 1, kind: input, shape index: {}]   ;;  %s2180_s2 = inlined_call_operand.hbm [shape: f32[3,128,128], index: 2, kind: input, shape index: {}]   ;;  %s2181_s3 = inlined_call_operand.hbm [shape: f32[3,128,128], index: 3, kind: input, shape index: {}]   ;;  %s2182_s4 = inlined_call_operand.vmem [shape: f32[3,1,128], index: 4, kind: input, shape index: {}]   ;;  %s2183_s5 = inlined_call_operand.vmem [shape: f32[1,128], index: 5, kind: input, shape index: {}]   ;;  %s2184_s6 = inlined_call_operand.vmem [shape: f32[1,128], index: 6, kind: input, shape index: {}]   ;;  %s2185_s7 = inlined_call_operand.vmem [shape: f32[1,128], index: 7, kind: input, shape index: {}]   ;;  %s2186_s8 = inlined_call_operand.hbm [shape: f32[16,128], index: 8, kind: output, shape index: {}]  }
   0x1   :  { %2207 = sst [smem:[#allocation33_spill]] %s2178_s0 }
   0x2   :  { %2208 = sst [smem:[#allocation34_spill]] %s2179_s1 }
   0x3   :  { %2209 = sst [smem:[#allocation35_spill]] %s2181_s3 }
   0x4   :  { %2210 = sst [smem:[#allocation36_spill]] %s2182_s4 }
   0x5   :  { %2211 = sst [smem:[#allocation37_spill]] %s2183_s5 }
   0x6   :  { %2212 = sst [smem:[#allocation38_spill]] %s2184_s6 }
   0x7   :  { %2213 = sst [smem:[#allocation39_spill]] %s2185_s7 }
   0x8   :  { %2214 = sst [smem:[#allocation40_spill]] %s2186_s8 }
   0x9   :  { %13 = vsyncpa [#allocation7], 0 }
   0xa   :  { %14 = vsyncpa [#allocation10], 0 }
   0xb   :  { %16 = vsyncpa [#allocation10 + $0x1], 0 }
   0xc   :  { %17 = vsyncpa [#allocation13], 0 }
   0xd   :  { %19 = vsyncpa [#allocation13 + $0x1], 0 }
   0xe   :  { %20 = vsyncpa [#allocation8], 0 }
   0xf   :  { %22 = vsyncpa [#allocation8 + $0x1], 0  ;;  %s1646_s27 = smov 0   ;;  %s1648_s28 = smov 0  }
  0x10   :  { %s1650_s29 = smov 0   ;;  %s1652_s30 = smov 0  }
  0x11   :  { %s1654_s9 = smov 0   ;;  %s1656_s10 = smov 0  }
  0x12   :  { %s1658_s11 = smov 0   ;;  %s1660_s12 = smov 0  }
  0x13   :  { %s1662_s13 = smov 0   ;;  %s1664_s14 = smov 0  }
  0x14   :  { %s1666_s15 = smov 0   ;;  %s1668_s16 = smov 0  }
  0x15   :  { %s1670_s17 = smov 0   ;;  %s1672_s18 = smov 0  }
  0x16 LB: > { %2215 = sst [smem:[#allocation20_spill]] %s1536_s27  ;;  %s37_s19 = sadd.s32 1, %s1580_s16  ;;  %s1588_s18 = sphi %s1672_s18, %s28_s18   ;;  %s1584_s17 = sphi %s1670_s17, %s2290_s17   ;;  %s1580_s16 = sphi %s1668_s16, %s2278_s16   ;;  %s1576_s15 = sphi %s1666_s15, %s2289_s15   ;;  %s1572_s14 = sphi %s1664_s14, %s2288_s14   ;;  %s1568_s13 = sphi %s1662_s13, %s2276_s13   ;;  %s1564_s12 = sphi %s1660_s12, %s2287_s12   ;;  %s1560_s11 = sphi %s1658_s11, %s2286_s11   ;;  %s1556_s10 = sphi %s1656_s10, %s2285_s10   ;;  %s1552_s9 = sphi %s1654_s9, %s2284_s9   ;;  %s1548_s30 = sphi %s1652_s30, %s2283_s30   ;;  %s1544_s29 = sphi %s1650_s29, %s2273_s29   ;;  %s1540_s28 = sphi %s1648_s28, %s2282_s28   ;;  %s1536_s27 = sphi %s1646_s27, %s2281_s27  }
  0x17   : > { %2216 = sst [smem:[#allocation21_spill]] %s1544_s29  ;;  %s40_s20 = sadd.s32 1, %s1584_s17 }
  0x18   : > { %2217 = sst [smem:[#allocation22_spill]] %s1568_s13  ;;  %p38_p0 = scmp.ge.s32.totalorder %s37_s19, 2 }
  0x19   : > { %2218 = sst [smem:[#allocation23_spill]] %s1572_s14  ;;  %s68_s21 = sadd.s32 1, %s1568_s13 }
  0x1a   : > { %2219 = sst [smem:[#allocation24_spill]] %s1576_s15  ;;  %p75_p1 = scmp.ne.s32.totalorder %s1568_s13, %s1564_s12 }
  0x1b   : > { %2220 = sst [smem:[#allocation25_spill]] %s1580_s16  ;;  %p76_p2 = scmp.eq.s32.totalorder %s1588_s18, 0 }
  0x1c   : > { %s2292_s19 = smov (%p38_p0, %s37_s19), 0  ;;  %s2294_s20 = smov (!%p38_p0, %s40_s20), %s1584_s17 }
  0x1d   : > { %2221 = sst [smem:[#allocation26_spill]] %s2292_s19  ;;  %s65_s22 = ssub.s32 %s1580_s16, %s2292_s19 }
  0x1e   : > { %p1729_p3 = por %p76_p2, %p75_p1  ;;  %p42_p4 = scmp.ge.s32.totalorder %s2294_s20, 3 }
  0x1f   : > { %p66_p5 = scmp.eq.s32.totalorder %s65_s22, 0  ;;  %s94_s24 = sadd.s32 1, %s1556_s10 }
  0x20   : > { %s2296_s20 = smov (%p42_p4, %s2294_s20), 0  ;;  %p101_p7 = scmp.ne.s32.totalorder %s1556_s10, %s1552_s9 }
  0x21   : > { %2223 = sst [smem:[#allocation27_spill]] %s2296_s20  ;;  %s91_s26 = ssub.s32 %s1584_s17, %s2296_s20 }
  0x22   : > { %s1739_s25 = scalar_select %p66_p5, %s1568_s13, %s68_s21  }
  0x23   : > { %p92_p8 = scmp.eq.s32.totalorder %s91_s26, 0  ;;  %p1749_p10 = por %p101_p7, %p76_p2 }
  0x24   : > { %2224 = sst [smem:[#allocation28_spill]] %s1739_s25  ;;  %p232_p11 = scmp.eq.s32.totalorder %s1584_s17, 2 }
  0x25   : > { %s1755_s8 = scalar_select %p92_p8, %s1556_s10, %s94_s24  }
  0x26   : > { %s233_s6 = scalar_select %p232_p11, %s1580_s16, 0 }
  0x27   : > { %2226 = sst [smem:[#allocation29_spill]] %s1755_s8  ;;  %p234_p12 = scmp.eq.s32.totalorder %s2296_s20, 2 }
  0x28   : > { %s239_s21 = sadd.s32 1, %s1544_s29  ;;  %p1188_p13 = scmp.lt.s32.totalorder %s1588_s18, 6 }
  0x29   : > { %s235_s25 = scalar_select %p234_p12, %s2292_s19, 0 }
  0x2a   : > { %s298_s26 = sand.u32 1, %s1588_s18   ;;  %s300_s5 = sand.u32 1, %s1568_s13  }
  0x2b   : > { %s236_s7 = ssub.s32 %s233_s6, %s235_s25  ;;  %s964_s14 = sshll.u32 %s300_s5, 3 }
  0x2c   : > { %p237_p0 = scmp.eq.s32.totalorder %s236_s7, 0  ;;  %s965_s4 = sshll.u32 %s1580_s16, 7 }
  0x2d   : > { %s2228_s1 = sld [smem:[#allocation34_spill]]  ;;  %s302_s20 = scalar_lea.vmem [#allocation9], %s964_s14 }
  0x2e   : > { %s1766_s15 = scalar_select %p237_p0, %s1544_s29, %s239_s21  }
  0x2f   : > { %s309_s0 = sshll.u32 %s302_s20, 4  ;;  %p1779_p1 = pnand %p1188_p13, %p1729_p3  ;;  %s1773_s0 = int_to_ptr.vmem [resolvable:$true] %s309_s0 }
  0x30   : > { %2227 = sst [smem:[#allocation30_spill]] %s1766_s15  ;;  %p1787_p2 = pnand %p1188_p13, %p1749_p10 }
  0x31   : > { %p1314_p5 = pneg %p1779_p1 }
  0x32   : > { %s2230_s3 = scalar_select %p1787_p2, 1, 0 }
  0x33   : > { %s1771_s8 = scalar_lea.hbm %s2228_s1, %s965_s4  ;;  %s1791_s4 = scalar_lea.sflag [#allocation10], %s298_s26 }
  0x34   : > { %s1312_s6 = scalar_lea.hbm %s1771_s8, 128  ;;  %s1317_s20 = scalar_lea.hbm %s2228_s1, 256 }
  0x35   : > { %p1313_p4 = scmp.ne.s32.totalorder %s1771_s8, %s1312_s6  ;;  %p1318_p8 = scmp.lt.u32.totalorder %s1771_s8, %s2228_s1 }
  0x36   : > { %p1319_p10 = scmp.lt.u32.totalorder %s1317_s20, %s1312_s6  ;;  %p1321_p12 = scmp.lt.u32.totalorder %s1312_s6, %s1771_s8 }
  0x37   : > { %p1315_p3 = pnand %p1314_p5, %p1313_p4 }
  0x38   : > { %p1320_p11 = por %p1319_p10, %p1318_p8 }
  0x39   : > { %p1316_p7 = pneg %p1315_p3 }
  0x3a   : > { %p1322_p13 = por %p1321_p12, %p1320_p11 }
  0x3c   : > { %p1323_p0 = pnand %p1322_p13, %p1316_p7 }
  0x3e   : > { %1326 = shalt.err (!%p1323_p0)
}
  0x3f   : > { %s1327_s22 = scalar_lea.vmem %s1773_s0, 128  ;;  %s1590_s21 = smov [#allocation9]  }
  0x40   : > { %p1328_p4 = scmp.ne.s32.totalorder %s1773_s0, %s1327_s22  ;;  %s1332_s26 = sshll.u32 %s1590_s21, 4  ;;  %s1333_s26 = int_to_ptr.vmem [resolvable:$false] %s1332_s26 }
  0x41   : > { %s1334_s24 = scalar_lea.vmem %s1333_s26, 256  ;;  %p1335_p6 = scmp.lt.s32.totalorder %s1773_s0, %s1333_s26 }
  0x42   : > { %p1330_p3 = pnand %p1328_p4, %p1314_p5  ;;  %p1336_p8 = scmp.lt.s32.totalorder %s1334_s24, %s1327_s22 }
  0x44   : > { %p1331_p9 = pneg %p1330_p3  ;;  %p1337_p10 = por %p1336_p8, %p1335_p6 }
  0x46   : > { %p1338_p11 = pnand %p1337_p10, %p1331_p9 }
  0x48   : > { %1341 = shalt.err (!%p1338_p11)
}
  0x49   : > { %1176 = dma.hbm_to_vmem [thread:$0]  (!%p1779_p1), %s1771_s8, 128, %s1773_s0, %s1791_s4  }
  0x4a   : > { %s1820_s6 = sadd.s32 4294967295, %s1588_s18   ;;  %s960_s5 = sadd.s32 4294967294, %s1588_s18  }
  0x4b   : > { %p2201_p6 = scmp.eq.s32.totalorder %s1820_s6, 0  ;;  %p249_p9 = scmp.ne.s32.totalorder %s1544_s29, %s1540_s28 }
  0x4c   : > { %p250_p5 = scmp.eq.s32.totalorder %s1820_s6, 5  ;;  %p2231_p7 = scmp.ne.s32.totalorder %s1564_s12, %s1560_s11 }
  0x4d   : > { %p2233_p1 = scmp.ne.s32.totalorder %s1552_s9, %s1548_s30  ;;  %p255_p4 = scmp.ne.s32.totalorder %s1540_s28, %s1536_s27 }
  0x4e   : > { %p1832_p12 = por %p2201_p6, %p2231_p7  ;;  %p1845_p0 = por %p250_p5, %p249_p9 }
  0x4f   : > { %p1841_p13 = por %p2233_p1, %p2201_p6  ;;  %p256_p3 = scmp.eq.s32.totalorder %s960_s5, 5 }
  0x50   : > { %s2232_s7 = scalar_select %p1832_p12, 1, 0 }
  0x51   : > { %s2234_s0 = scalar_select %p1841_p13, 1, 0 }
  0x52   : > { %s2235_s8 = scalar_select %p1845_p0, 1, 0 }
  0x53   : > { %p961_p8 = scmp.ge.s32.totalorder %s1588_s18, 1  ;;  %p263_p10 = scmp.lt.s32.totalorder %s1588_s18, 7 }
  0x54   : > { %2236 = sst [smem:[#allocation31_spill]] %s2235_s8  ;;  %p1853_p11 = por %p256_p3, %p255_p4 }
  0x55   : > { %p1857_p7 = pnand %p961_p8, %p263_p10  ;;  %s1591_s14 = smov [#allocation6]  }
  0x56   : > { %s2237_s11 = scalar_select %p1853_p11, 1, 0 }
  0x57   : > { %s2239_s30 = scalar_select %p1857_p7, 1, 0 }
  0x58   : > { %2238 = sst [smem:[#allocation32_spill]] %s2237_s11  ;;  %s275_s20 = sshll.u32 %s1591_s14, 4  ;;  %s1861_s20 = int_to_ptr.vmem [resolvable:$true] %s275_s20 }
  0x59   : > { %p1169_p9 = pneg %p1857_p7  ;;  %s2199_s23 = sand.u32 1, %s1556_s10  }
  0x5a   : > { %s990_s25 = sshll.u32 %s1584_s17, 11  ;;  %s1875_s21 = sshll.u32 %s2199_s23, 7 }
  0x5b   : > { %p1869_p5 = pnand %p1169_p9, %p2201_p6  ;;  %s1882_s5 = scalar_lea.hbm %s2180_s2, %s990_s25 }
  0x5c   : > { %s320_s14 = scalar_lea.vmem [#allocation11], %s1875_s21  ;;  %s2241_s13 = sld [smem:[#allocation33_spill]] }
  0x5d   : > { %s327_s1 = sshll.u32 %s320_s14, 4  ;;  %p1344_p4 = pneg %p1869_p5  ;;  %s1909_s1 = int_to_ptr.vmem [resolvable:$true] %s327_s1 }
  0x62   : > { %s2242_s8 = smov %s2241_s13  ;;  %s1342_s15 = scalar_lea.hbm %s2241_s13, 256 }
  0x63   : > { %p1343_p1 = scmp.ne.s32.totalorder %s2242_s8, %s1342_s15  ;;  %p1349_p10 = scmp.lt.u32.totalorder %s1342_s15, %s2242_s8 }
  0x65   : > { %p1345_p3 = pnand %p1344_p4, %p1343_p1 }
  0x67   : > { %p1346_p8 = pneg %p1345_p3 }
  0x69   : > { %p1351_p9 = pnand %p1349_p10, %p1346_p8 }
  0x6b   : > { %1354 = shalt.err (!%p1351_p9)
}
  0x6c   : > { %s1355_s26 = scalar_lea.vmem %s1861_s20, 256  ;;  %p1363_p13 = scmp.lt.s32.totalorder %s1861_s20, %s1861_s20 }
  0x6d   : > { %p1356_p6 = scmp.ne.s32.totalorder %s1861_s20, %s1355_s26  ;;  %p1364_p12 = scmp.lt.s32.totalorder %s1355_s26, %s1355_s26 }
  0x6f   : > { %p1358_p11 = pnand %p1356_p6, %p1344_p4  ;;  %p1365_p7 = por %p1364_p12, %p1363_p13 }
  0x71   : > { %p1359_p0 = pneg %p1358_p11 }
  0x73   : > { %p1366_p2 = pnand %p1365_p7, %p1359_p0 }
  0x75   : > { %1369 = shalt.err (!%p1366_p2)
}
  0x76   : > { %s1592_s29 = smov 128   ;;  %s1593_s27 = smov 8  }
  0x77   : > { %1172 = dma.hbm_to_vmem [thread:$0]  (!%p1869_p5), %s2242_s8, 256, %s1861_s20, [#allocation7], %s1592_s29, %s1592_s29, %s1593_s27  }
  0x78   : > { %s1370_s16 = scalar_lea.hbm %s1882_s5, 2048  ;;  %p2243_p6 = scmp.ne.s32.totalorder %s2230_s3, 0 }
  0x79   : > { %p1371_p2 = scmp.ne.s32.totalorder %s1882_s5, %s1370_s16  ;;  %s1375_s23 = scalar_lea.hbm %s2180_s2, 6144 }
  0x7a   : > { %p1372_p12 = pneg %p2243_p6  ;;  %p1376_p11 = scmp.lt.u32.totalorder %s1882_s5, %s2180_s2 }
  0x7b   : > { %p1377_p7 = scmp.lt.u32.totalorder %s1375_s23, %s1370_s16  ;;  %p1379_p1 = scmp.lt.u32.totalorder %s1370_s16, %s1882_s5 }
  0x7c   : > { %p1373_p13 = pnand %p1372_p12, %p1371_p2 }
  0x7d   : > { %p1378_p5 = por %p1377_p7, %p1376_p11 }
  0x7e   : > { %p1374_p0 = pneg %p1373_p13 }
  0x7f   : > { %p1380_p4 = por %p1379_p1, %p1378_p5 }
  0x81   : > { %p1381_p3 = pnand %p1380_p4, %p1374_p0 }
  0x83   : > { %1384 = shalt.err (!%p1381_p3)
}
  0x84   : > { %s1385_s20 = scalar_lea.vmem %s1909_s1, 2048  ;;  %s1594_s14 = smov [#allocation11]  }
  0x85   : > { %p1386_p8 = scmp.ne.s32.totalorder %s1909_s1, %s1385_s20  ;;  %s1390_s26 = sshll.u32 %s1594_s14, 4  ;;  %s1391_s26 = int_to_ptr.vmem [resolvable:$false] %s1390_s26 }
  0x86   : > { %s1392_s13 = scalar_lea.vmem %s1391_s26, 4096  ;;  %p1393_p2 = scmp.lt.s32.totalorder %s1909_s1, %s1391_s26 }
  0x87   : > { %p1388_p10 = pnand %p1386_p8, %p1372_p12  ;;  %p1394_p13 = scmp.lt.s32.totalorder %s1392_s13, %s1385_s20 }
  0x89   : > { %p1389_p9 = pneg %p1388_p10  ;;  %p1395_p11 = por %p1394_p13, %p1393_p2 }
  0x8b   : > { %p1396_p7 = pnand %p1395_p11, %p1389_p9 }
  0x8d   : > { %1399 = shalt.err (!%p1396_p7)
}
  0x8e   : > { %1179 = dma.hbm_to_vmem [thread:$0]  (!%p2243_p6), %s1882_s5, 2048, %s1909_s1, %s1791_s4, %s1592_s29, %s1592_s29, %s1593_s27  }
  0x8f   : > { %s2244_s19 = sld [smem:[#allocation35_spill]]  ;;  %s341_s23 = scalar_lea.vmem [#allocation12], %s1875_s21 }
  0x90   : > { %s348_s22 = sshll.u32 %s341_s23, 4  ;;  %s2245_s24 = sand.u32 1, %s1556_s10   ;;  %s1948_s22 = int_to_ptr.vmem [resolvable:$true] %s348_s22 }
  0x91   : > { %s1952_s20 = scalar_lea.sflag [#allocation13], %s2245_s24 }
  0x95   : > { %s1945_s11 = scalar_lea.hbm %s2244_s19, %s990_s25  ;;  %s1405_s25 = scalar_lea.hbm %s2244_s19, 6144 }
  0x96   : > { %s1400_s14 = scalar_lea.hbm %s1945_s11, 2048  ;;  %p1406_p4 = scmp.lt.u32.totalorder %s1945_s11, %s2244_s19 }
  0x97   : > { %p1401_p0 = scmp.ne.s32.totalorder %s1945_s11, %s1400_s14  ;;  %p1407_p3 = scmp.lt.u32.totalorder %s1405_s25, %s1400_s14 }
  0x98   : > { %p1409_p10 = scmp.lt.u32.totalorder %s1400_s14, %s1945_s11 }
  0x99   : > { %p1403_p5 = pnand %p1401_p0, %p1372_p12  ;;  %p1408_p8 = por %p1407_p3, %p1406_p4 }
  0x9b   : > { %p1404_p1 = pneg %p1403_p5  ;;  %p1410_p9 = por %p1409_p10, %p1408_p8 }
  0x9d   : > { %p1411_p2 = pnand %p1410_p9, %p1404_p1 }
  0x9f   : > { %1414 = shalt.err (!%p1411_p2)
}
  0xa0   : > { %s1415_s21 = scalar_lea.vmem %s1948_s22, 2048  ;;  %s1595_s13 = smov [#allocation12]  }
  0xa1   : > { %p1416_p13 = scmp.ne.s32.totalorder %s1948_s22, %s1415_s21  ;;  %s1420_s15 = sshll.u32 %s1595_s13, 4  ;;  %s1421_s15 = int_to_ptr.vmem [resolvable:$false] %s1420_s15 }
  0xa2   : > { %s1422_s16 = scalar_lea.vmem %s1421_s15, 4096  ;;  %p1423_p0 = scmp.lt.s32.totalorder %s1948_s22, %s1421_s15 }
  0xa3   : > { %p1418_p11 = pnand %p1416_p13, %p1372_p12  ;;  %p1424_p5 = scmp.lt.s32.totalorder %s1422_s16, %s1415_s21 }
  0xa5   : > { %p1419_p7 = pneg %p1418_p11  ;;  %p1425_p4 = por %p1424_p5, %p1423_p0 }
  0xa7   : > { %p1426_p3 = pnand %p1425_p4, %p1419_p7 }
  0xa9   : > { %1429 = shalt.err (!%p1426_p3)
}
  0xaa   : > { %1182 = dma.hbm_to_vmem [thread:$0]  (!%p2243_p6), %s1945_s11, 2048, %s1948_s22, %s1952_s20, %s1592_s29, %s1592_s29, %s1593_s27  }
  0xab   : > { %p2246_p12 = scmp.ne.s32.totalorder %s2239_s30, 0 }
  0xac   : > { %p2247_p1 = scmp.eq.s32.totalorder (!%p2246_p12), %s1820_s6, 0 }
  0xad   : > { %366 = sbr.rel (%p2246_p12) target bundleno = 768 (0x300), region = 52 }
  0xb4   : > { %1515 = dma.done.wait (%p2247_p1), [#allocation7], 256   ;;  %p2248_p8 = pmov %p2247_p1 }
  0xb5   : > { %s372_s3 = sand.u32 1, %s1820_s6   ;;  %s374_s23 = sand.u32 1, %s1564_s12  }
  0xb6   : > { %1517 = vsyncadd (%p2248_p8), [#allocation7], 4294967040  ;;  %s1989_s24 = sshll.u32 %s374_s23, 3  ;;  %s373_s14 = scalar_lea.sflag [#allocation10], %s372_s3 }
  0xb7   : > { %s376_s1 = scalar_lea.vmem [#allocation9], %s1989_s24  ;;  %p2249_p6 = scmp.ne.s32.totalorder %s2232_s7, 0 }
  0xb9   : > { %1519 = dma.done.wait (%p2249_p6), %s373_s14, 128  }
  0xba   : > { %1521 = vsyncadd (%p2249_p6), %s373_s14, 4294967168  ;;  %s383_s30 = sand.u32 1, %s1552_s9   ;;  %p2250_p10 = scmp.ne.s32.totalorder %s2234_s0, 0 }
  0xbb   : > { %s975_s29 = sshll.u32 %s383_s30, 7 }
  0xbc   : > { %s1997_s27 = scalar_lea.vmem [#allocation11], %s975_s29 }
  0xbd   : > { %1523 = dma.done.wait (%p2250_p10), %s373_s14, 2048  }
  0xbe   : > { %1525 = vsyncadd (%p2250_p10), %s373_s14, 4294965248  ;;  %s391_s6 = scalar_lea.sflag [#allocation13], %s383_s30  ;;  %s2003_s11 = scalar_lea.vmem [#allocation12], %s975_s29 }
  0xbf   : > { %1527 = dma.done.wait (%p2250_p10), %s391_s6, 2048  }
  0xc0   : > { %1529 = vsyncadd (%p2250_p10), %s391_s6, 4294965248  ;;  %s2251_s7 = sld [smem:[#allocation24_spill]]  ;;  %s437_s22 = sand.u32 1, %s1540_s28  }
  0xc1   : > { %s2013_s20 = sshll.u32 %s437_s22, 3  ;;  %s2252_s5 = sld [smem:[#allocation36_spill]] }
  0xc2   : > { %s439_s21 = scalar_lea.vmem [#allocation14], %s2013_s20  ;;  %s2253_s0 = sld [smem:[#allocation23_spill]] }
  0xc6   : > { %p440_p9 = scmp.lt.s32.totalorder %s2251_s7, 2 }
  0xc8   : > { %s2298_s7 = smov (!%p440_p9, %s2251_s7), 2  ;;  %p978_p2 = scmp.ne.s32.totalorder %s2253_s0, 0 }
  0xc9   : > { %s442_s26 = scalar_lea.vmem %s2252_s5, %s2298_s7  ;;  %s2254_s13 = sld [smem:[#allocation24_spill]] (!%p978_p2) }
  0xca   : > { %448 = sbr.rel (%p978_p2) target bundleno = 268 (0x10c), region = 72 }
  0xcf   : > { %p979_p13 = scmp.ne.s32.totalorder (!%p978_p2), %s2254_s13, 0 }
  0xd1   : > { %452 = sbr.rel (%p979_p13) target bundleno = 216 (0xd8), region = 76  ;;  %v453_v0 = vld [vmem:[#allocation6] sm:$0xff] (!%p979_p13)  ;;  %v454_v1 = vld [vmem:[#allocation6 + $0x8] sm:$0xff] (!%p979_p13) }
  0xd2   : > { %455 = vst [vmem:[#allocation2] sm:$0xff] (!%p979_p13), %v453_v0  ;;  %456 = vst [vmem:[#allocation2 + $0x8] sm:$0xff] (!%p979_p13), %v454_v1 }
  0xd8 PF: > { %s2255_s15 = sld [smem:[#allocation24_spill]] }
  0xde   : > { %p980_p11 = scmp.le.s32.totalorder %s2255_s15, 0 }
  0xdf   : > { %v461_v2 = vld [vmem:[#allocation4] sm:$0x1] (!%p980_p11)  ;;  %s2256_s23 = sld [smem:[#allocation39_spill]] (!%p980_p11)  ;;  %v463_v7 = vld [vmem:[#allocation5] sm:$0x1] (!%p980_p11)  ;;  %v484_v15 = vlaneseq (!%p980_p11)  ;;  %s2257_s29 = sld [smem:[#allocation37_spill]] (!%p980_p11) }
  0xe0   : > { %460 = sbr.rel (%p980_p11) target bundleno = 266 (0x10a), region = 80  ;;  %v462_v4 = vmul.f32 (!%p980_p11), 0.0625, %v461_v2  ;;  %v464_v9 = vmul.f32 (!%p980_p11), 0.0625, %v463_v7  ;;  %s2258_s25 = sld [smem:[#allocation38_spill]] (!%p980_p11)  ;;  %v481_v23 = vld [vmem:[#allocation3] sm:$0xff] (!%p980_p11)  ;;  %v482_v24 = vld [vmem:[#allocation3 + $0x8] sm:$0xff] (!%p980_p11) }
  0xe1   : > { %v485_v16 = vshrl.u32 (!%p980_p11), %v484_v15, 7 }
  0xe3   : > { %v486_v19 = vsub.s32 (!%p980_p11), 0, %v485_v16 }
  0xe5   : > { %v465_v3 = vld [vmem:[%s2256_s23] sm:$0x1] (!%p980_p11) }
  0xe6   : > { %v466_v5 = vmul.f32 (!%p980_p11), 2.0, %v465_v3  ;;  %v467_v6 = vmul.f32 (!%p980_p11), %v465_v3, %v465_v3  ;;  %v473_v17 = vld [vmem:[%s2257_s29] sm:$0x1] (!%p980_p11)  ;;  %v478_v18 = vmul.f32 (!%p980_p11), %v465_v3, %v462_v4 }
  0xe7   : > { %v477_v22 = vld [vmem:[%s2258_s25] sm:$0x1] }
  0xe8   : > { %v468_v8 = vsub.f32 %v466_v5, %v467_v6 }
  0xea   : > { %v469_v10 = vmul.f32 %v468_v8, %v462_v4 }
  0xec   : > { %v470_v11 = vmul.f32 %v469_v10, %v462_v4 }
  0xee   : > { %v471_v12 = vsub.f32 %v464_v9, %v470_v11 }
  0xf0   : > { %v472_v13 = vmax.f32 %v471_v12, 0.0 }
  0xf2   : > { %v474_v14 = vadd.f32 1e-05, %v472_v13 }
  0xf4   : > { %1310 = vrsqrt.f32 %v474_v14 }
  0xfe   : > { %v1311_v20 = vpop.eup %1310 }
  0xff   : > { %v476_v21 = vmul.f32 %v1311_v20, %v473_v17 }
 0x101   : > { %v479_v25 = vmul.f32 %v478_v18, %v476_v21  ;;  %v487_v26 = vrot.slane %v476_v21, %v486_v19 }
 0x103   : > { %v480_v27 = vsub.f32 %v477_v22, %v479_v25  ;;  %v489_v28 = vmul.f32 %v487_v26, %v481_v23  ;;  %v490_v29 = vmul.f32 %v487_v26, %v482_v24 }
 0x105   : > { %v495_v30 = vrot.slane %v480_v27, %v486_v19 }
 0x107   : > { %v497_v31 = vadd.f32 %v495_v30, %v489_v28  ;;  %v498_v32 = vadd.f32 %v495_v30, %v490_v29 }
 0x109   : > { %499 = vst [vmem:[#allocation2] sm:$0xff] %v497_v31  ;;  %500 = vst [vmem:[#allocation2 + $0x8] sm:$0xff] %v498_v32 }
 0x10a PF: > { %v1596_v33 = vmov 0.0  }
 0x10b   : > { %501 = vst [vmem:[#allocation4] sm:$0x1] %v1596_v33  ;;  %502 = vst [vmem:[#allocation5] sm:$0x1] %v1596_v33 }
 0x10c PF: > { %v1597_v36 = vmov 0.0|0.0   ;;  %vm1598_vm0 = vmmov 0   ;;  %v1599_v38 = vmov 0.0   ;;  %v599_v39 = vld [vmem:[%s2003_s11] sm:$0xff]  ;;  %v600_v40 = vld [vmem:[%s2003_s11 + $0x8] sm:$0xff]  ;;  %v601_v44 = vld [vmem:[%s2003_s11 + $0x10] sm:$0xff] }
 0x10d   : > { %1106 = vmatprep.subr.bf16.mxu0 %v1597_v36  ;;  %1033 = vmatprep.mubr.msk.f32.mxu0 %vm1598_vm0, %v1599_v38  ;;  %v583_v41 = vld [vmem:[%s1997_s27] sm:$0xff]  ;;  %v1110_v42 = vpack.c.bf16 %v600_v40, %v599_v39  ;;  %v584_v43 = vld [vmem:[%s1997_s27 + $0x8] sm:$0xff]  ;;  %v602_v45 = vld [vmem:[%s2003_s11 + $0x18] sm:$0xff]  ;;  %vm509_vm1 = vcmask 130048   ;;  %s2259_s24 = sld [smem:[#allocation23_spill]]  ;;  %s2261_s13 = sld [smem:[#allocation24_spill]] }
 0x10e   : > { %1109 = vmatprep.subr.bf16.mxu1 %v1597_v36  ;;  %1068 = vmatprep.mubr.msk.f32.mxu1 %vm1598_vm0, %v1599_v38  ;;  %v508_v46 = vld [vmem:[%s376_s1] sm:$0xff]  ;;  %v1134_v47 = vpack.c.bf16 %v584_v43, %v583_v41  ;;  %v1113_v48 = vpack.c.bf16 %v602_v45, %v601_v44  ;;  %v603_v51 = vld [vmem:[%s2003_s11 + $0x20] sm:$0xff]  ;;  %v604_v52 = vld [vmem:[%s2003_s11 + $0x28] sm:$0xff] }
 0x10f   : > { %1111 = vmatpush3.bf16.msra.mxu1 %v1110_v42  ;;  %v585_v49 = vld [vmem:[%s1997_s27 + $0x10] sm:$0xff]  ;;  %v586_v50 = vld [vmem:[%s1997_s27 + $0x18] sm:$0xff]  ;;  %v1116_v54 = vpack.c.bf16 %v604_v52, %v603_v51  ;;  %v587_v55 = vld [vmem:[%s1997_s27 + $0x20] sm:$0xff] }
 0x110   : > { %v504_v34 = vld [vmem:[#allocation2] sm:$0xff]  ;;  %v505_v35 = vld [vmem:[#allocation2 + $0x8] sm:$0xff]  ;;  %1112 = vmatprep.subr.bf16.mxu1 %v1597_v36  ;;  %v1137_v53 = vpack.c.bf16 %v586_v50, %v585_v49  ;;  %v605_v57 = vld [vmem:[%s2003_s11 + $0x30] sm:$0xff] }
 0x111   : > { %v1107_v37 = vpack.c.bf16 %v505_v35, %v504_v34  ;;  %v588_v56 = vld [vmem:[%s1997_s27 + $0x28] sm:$0xff]  ;;  %v606_v58 = vld [vmem:[%s2003_s11 + $0x38] sm:$0xff]  ;;  %v589_v61 = vld [vmem:[%s1997_s27 + $0x30] sm:$0xff] }
 0x112   : > { %v1140_v59 = vpack.c.bf16 %v588_v56, %v587_v55  ;;  %v1119_v60 = vpack.c.bf16 %v606_v58, %v605_v57  ;;  %v590_v62 = vld [vmem:[%s1997_s27 + $0x38] sm:$0xff]  ;;  %v607_v63 = vld [vmem:[%s2003_s11 + $0x40] sm:$0xff]  ;;  %v608_v0 = vld [vmem:[%s2003_s11 + $0x48] sm:$0xff] }
 0x113   : > { %1108 = vmatpush3.bf16.msra.mxu0 %v1107_v37  ;;  %1114 = vmatpush3.bf16.msra.mxu1 %v1113_v48  ;;  %v1143_v1 = vpack.c.bf16 %v590_v62, %v589_v61  ;;  %v1122_v2 = vpack.c.bf16 %v608_v0, %v607_v63  ;;  %v591_v3 = vld [vmem:[%s1997_s27 + $0x40] sm:$0xff]  ;;  %v592_v4 = vld [vmem:[%s1997_s27 + $0x48] sm:$0xff]  ;;  %v609_v5 = vld [vmem:[%s2003_s11 + $0x50] sm:$0xff]  ;;  %s981_s1 = sshll.u32 %s2259_s24, 3  ;;  %p984_p7 = scmp.ge.s32.totalorder %s2261_s13, 2 }
 0x114   : > { %1133 = vmatprep.subr.bf16.mxu0 %v1597_v36  ;;  %1115 = vmatprep.subr.bf16.mxu1 %v1597_v36  ;;  %v610_v6 = vld [vmem:[%s2003_s11 + $0x58] sm:$0xff]  ;;  %v1146_v7 = vpack.c.bf16 %v592_v4, %v591_v3  ;;  %v593_v9 = vld [vmem:[%s1997_s27 + $0x50] sm:$0xff]  ;;  %v611_v11 = vld [vmem:[%s2003_s11 + $0x60] sm:$0xff]  ;;  %s506_s5 = scalar_lea.vmem [#allocation2], %s981_s1  ;;  %s768_s15 = scalar_lea.vmem (!%p984_p7), [#allocation3], %s981_s1 }
 0x115   : > { %v1125_v8 = vpack.c.bf16 %v610_v6, %v609_v5  ;;  %v594_v10 = vld [vmem:[%s1997_s27 + $0x58] sm:$0xff]  ;;  %v612_v12 = vld [vmem:[%s2003_s11 + $0x68] sm:$0xff]  ;;  %v595_v15 = vld [vmem:[%s1997_s27 + $0x60] sm:$0xff] }
 0x116   : > { %1034 = vmatmul.mubr.msk.f32.vlgmr.msra.gmra.mrb[0].mxu0 %vm509_vm1, %v508_v46  ;;  %v1149_v13 = vpack.c.bf16 %v594_v10, %v593_v9  ;;  %v1128_v14 = vpack.c.bf16 %v612_v12, %v611_v11  ;;  %v596_v16 = vld [vmem:[%s1997_s27 + $0x68] sm:$0xff]  ;;  %v613_v17 = vld [vmem:[%s2003_s11 + $0x70] sm:$0xff]  ;;  %v614_v18 = vld [vmem:[%s2003_s11 + $0x78] sm:$0xff] }
 0x117   : > { %1135 = vmatpush3.bf16.msra.mxu0 %v1134_v47  ;;  %1103 = vmatprep.mubr.msk.f32.mxu0 %vm1598_vm0, %v1599_v38  ;;  %v1152_v19 = vpack.c.bf16 %v596_v16, %v595_v15  ;;  %v1131_v20 = vpack.c.bf16 %v614_v18, %v613_v17  ;;  %v597_v21 = vld [vmem:[%s1997_s27 + $0x70] sm:$0xff]  ;;  %v598_v22 = vld [vmem:[%s1997_s27 + $0x78] sm:$0xff] }
 0x118   : > { %1136 = vmatprep.subr.bf16.mxu0 %v1597_v36  ;;  %1117 = vmatpush3.bf16.msra.mxu1 %v1116_v54  ;;  %v1155_v23 = vpack.c.bf16 %v598_v22, %v597_v21  ;;  %v507_v24 = vld [vmem:[%s506_s5] sm:$0xff] }
 0x119   : > { %1118 = vmatprep.subr.bf16.mxu1 %v1597_v36  ;;  %v983_v30 = vld [vmem:[%s442_s26] ss:$0 sm:$0xff]  ;;  %v779_v48 = vld [vmem:[#allocation5] sm:$0x1] (!%p984_p7) }
 0x11a   : > { %v770_v45 = vld [vmem:[#allocation4] sm:$0x1] (!%p984_p7) }
 0x11b   : > { %1138 = vmatpush3.bf16.msra.mxu0 %v1137_v53 }
 0x11c   : > { %1139 = vmatprep.subr.bf16.mxu0 %v1597_v36  ;;  %1120 = vmatpush3.bf16.msra.mxu1 %v1119_v60 }
 0x11d   : > { %1121 = vmatprep.subr.bf16.mxu1 %v1597_v36 }
 0x11f   : > { %1141 = vmatpush3.bf16.msra.mxu0 %v1140_v59 }
 0x120   : > { %1142 = vmatprep.subr.bf16.mxu0 %v1597_v36  ;;  %1123 = vmatpush3.bf16.msra.mxu1 %v1122_v2 }
 0x121   : > { %1124 = vmatprep.subr.bf16.mxu1 %v1597_v36 }
 0x123   : > { %1144 = vmatpush3.bf16.msra.mxu0 %v1143_v1 }
 0x124   : > { %1145 = vmatprep.subr.bf16.mxu0 %v1597_v36  ;;  %1126 = vmatpush3.bf16.msra.mxu1 %v1125_v8 }
 0x125   : > { %1127 = vmatprep.subr.bf16.mxu1 %v1597_v36 }
 0x127   : > { %1147 = vmatpush3.bf16.msra.mxu0 %v1146_v7 }
 0x128   : > { %1148 = vmatprep.subr.bf16.mxu0 %v1597_v36  ;;  %1129 = vmatpush3.bf16.msra.mxu1 %v1128_v14 }
 0x129   : > { %1130 = vmatprep.subr.bf16.mxu1 %v1597_v36 }
 0x12b   : > { %1150 = vmatpush3.bf16.msra.mxu0 %v1149_v13 }
 0x12c   : > { %1151 = vmatprep.subr.bf16.mxu0 %v1597_v36  ;;  %1132 = vmatpush3.bf16.msra.mxu1 %v1131_v20 }
 0x12f   : > { %1153 = vmatpush3.bf16.msra.mxu0 %v1152_v19  ;;  %1069 = vmatmul.mubr.f32.vlgmr.msra.gmra.mrb[0].mxu1 %v507_v24 }
 0x130   : > { %1154 = vmatprep.subr.bf16.mxu0 %v1597_v36 }
 0x133   : > { %1156 = vmatpush3.bf16.msra.mxu0 %v1155_v23 }
 0x1e9   : > { %v579_v25 = vpop.f32.mrb[0].mxu0 }
 0x1ea   : > { %v1035_v26 = vpop.f32.mrb[1].mxu0  ;;  %1104 = vmatmul.mubr.f32.vlgmr.msra.gmra.mrb[2].mxu0 %v579_v25 }
 0x202   : > { %v681_v27 = vpop.f32.mrb[0].mxu1 }
 0x203   : > { %v1070_v28 = vpop.f32.mrb[1].mxu1 }
 0x2ba   : > { %766 = sbr.rel (%p984_p7) target bundleno = 725 (0x2d5), region = 84 }
 0x2bd   : > { %v751_v29 = vpop.f32.mrb[2].mxu0 }
 0x2be   : > { %v752_v31 = vadd.f32 %v751_v29, %v681_v27  ;;  %v1105_v32 = vpop.f32.mrb[3].mxu0 }
 0x2c0   : > { %v762_v33 = vadd.f32 %v983_v30, %v752_v31 }
 0x2c2   : > { %v767_v34 = vmax.f32 %v762_v33, 0.0 }
 0x2c4   : > { %769 = vst [vmem:[%s768_s15] sm:$0xff] %v767_v34  ;;  %v771_v35 = vrot.slane %v767_v34, 4  ;;  %v780_v36 = vmul.f32 %v767_v34, %v767_v34 }
 0x2c6   : > { %v772_v37 = vadd.f32 %v771_v35, %v767_v34  ;;  %v781_v38 = vrot.slane %v780_v36, 4 }
 0x2c8   : > { %v773_v39 = vrot.slane %v772_v37, 2  ;;  %v782_v40 = vadd.f32 %v781_v38, %v780_v36 }
 0x2ca   : > { %v774_v41 = vadd.f32 %v773_v39, %v772_v37  ;;  %v783_v42 = vrot.slane %v782_v40, 2 }
 0x2cc   : > { %v775_v43 = vrot.slane %v774_v41, 1  ;;  %v784_v44 = vadd.f32 %v783_v42, %v782_v40 }
 0x2ce   : > { %v776_v46 = vadd.f32 %v775_v43, %v774_v41  ;;  %v785_v47 = vrot.slane %v784_v44, 1 }
 0x2d0   : > { %v777_v49 = vadd.f32 %v776_v46, %v770_v45  ;;  %v786_v50 = vadd.f32 %v785_v47, %v784_v44 }
 0x2d2   : > { %778 = vst [vmem:[#allocation4] sm:$0x1] %v777_v49  ;;  %v787_v51 = vadd.f32 %v786_v50, %v779_v48 }
 0x2d4   : > { %788 = vst [vmem:[#allocation5] sm:$0x1] %v787_v51 }
 0x2d5 PF: > { %s2262_s7 = sld [smem:[#allocation24_spill]] }
 0x2db   : > { %p985_p0 = scmp.ne.s32.totalorder %s2262_s7, 2 }
 0x2dc   : > { %793 = vst [vmem:[%s439_s21] sm:$0xff] (!%p985_p0), %v762_v33 }
 0x2dd   : > { %792 = sbr.rel (%p985_p0) target bundleno = 740 (0x2e4), region = 88 }
 0x2e4 PF: > { %s2263_s26 = sld [smem:[#allocation24_spill]]  ;;  %s2264_s16 = sld [smem:[#allocation23_spill]] }
 0x2e5   : > { %s2265_s3 = sld [smem:[#allocation31_spill]]  ;;  %s810_s23 = sshll.u32 %s439_s21, 4  ;;  %s2103_s23 = int_to_ptr.vmem [resolvable:$true] %s810_s23 }
 0x2e6   : > { %s2266_s6 = sld [smem:[#allocation40_spill]]  ;;  %s795_s25 = scalar_lea.sflag [#allocation8], %s437_s22 }
 0x2e7   : > { %s1430_s24 = scalar_lea.vmem %s2103_s23, 128  ;;  %s1600_s20 = smov [#allocation14]  }
 0x2e8   : > { %p1431_p4 = scmp.ne.s32.totalorder %s2103_s23, %s1430_s24  ;;  %s1434_s21 = sshll.u32 %s1600_s20, 4  ;;  %s1435_s21 = int_to_ptr.vmem [resolvable:$false] %s1434_s21 }
 0x2e9   : > { %s1436_s1 = scalar_lea.vmem %s1435_s21, 256  ;;  %p1437_p8 = scmp.lt.s32.totalorder %s2103_s23, %s1435_s21 }
 0x2ea   : > { %p802_p5 = scmp.eq.s32.totalorder %s2263_s26, 2  ;;  %p1438_p6 = scmp.lt.s32.totalorder %s1436_s1, %s1430_s24 }
 0x2eb   : > { %p2267_p3 = scmp.ne.s32.totalorder %s2265_s3, 0 }
 0x2ec   : > { %s2300_s16 = smov (!%p802_p5, %s2264_s16), 0  ;;  %p1439_p10 = por %p1438_p6, %p1437_p8 }
 0x2ed   : > { %s987_s14 = sshll.u32 %s2300_s16, 7  ;;  %p1432_p12 = pnand %p1431_p4, %p2267_p3 }
 0x2ee   : > { %s808_s4 = scalar_lea.hbm %s2266_s6, %s987_s14 }
 0x2ef   : > { %p1433_p1 = pneg %p1432_p12 }
 0x2f1   : > { %p1440_p9 = pnand %p1439_p10, %p1433_p1 }
 0x2f3   : > { %1443 = shalt.err (!%p1440_p9)
}
 0x2f4   : > { %s1444_s5 = scalar_lea.hbm %s808_s4, 128  ;;  %s1448_s11 = scalar_lea.hbm %s2266_s6, 256 }
 0x2f5   : > { %p1445_p2 = scmp.ne.s32.totalorder %s808_s4, %s1444_s5  ;;  %p1449_p7 = scmp.lt.u32.totalorder %s808_s4, %s2266_s6 }
 0x2f6   : > { %p1450_p0 = scmp.lt.u32.totalorder %s1448_s11, %s1444_s5  ;;  %p1452_p4 = scmp.lt.u32.totalorder %s1444_s5, %s808_s4 }
 0x2f7   : > { %p1446_p13 = pnand %p1445_p2, %p2267_p3 }
 0x2f8   : > { %p1451_p5 = por %p1450_p0, %p1449_p7 }
 0x2f9   : > { %p1447_p11 = pneg %p1446_p13 }
 0x2fa   : > { %p1453_p12 = por %p1452_p4, %p1451_p5 }
 0x2fc   : > { %p1454_p1 = pnand %p1453_p12, %p1447_p11 }
 0x2fe   : > { %1457 = shalt.err (!%p1454_p1)
}
 0x2ff   : > { %1167 = dma.vmem_to_hbm [thread:$0]  (%p2267_p3), %s2103_s23, 128, %s808_s4, %s795_s25  }
 0x300 PF: > { %s2268_s15 = sld [smem:[#allocation20_spill]]  ;;  %s2269_s7 = sld [smem:[#allocation32_spill]] }
 0x301   : > { %p1190_p8 = scmp.ge.s32.totalorder %s1588_s18, 2 }
 0x306   : > { %s822_s26 = sand.u32 1, %s2268_s15   ;;  %p2270_p6 = scmp.ne.s32.totalorder %s2269_s7, 0 }
 0x307   : > { %s823_s16 = scalar_lea.sflag [#allocation8], %s822_s26 }
 0x308   : > { %p1184_p10 = pnand %p1190_p8, %p2270_p6 }
 0x30a   : > { %1531 = dma.done.wait (!%p1184_p10), %s823_s16, 128  }
 0x30b   : > { %1533 = vsyncadd (!%p1184_p10), %s823_s16, 4294967168  ;;  %s28_s18 = sadd.s32 1, %s1588_s18   ;;  %s2272_s3 = sld [smem:[#allocation21_spill]] }
 0x30c   : > { %p2131_p9 = scmp.ge.s32.totalorder %s28_s18, 8   ;;  %s2273_s29 = sld [smem:[#allocation30_spill]] }
 0x30d   : > { %s2274_s23 = sld [smem:[#allocation29_spill]]  ;;  %s2275_s4 = sld [smem:[#allocation22_spill]] }
 0x30e   : > { %s2276_s13 = sld [smem:[#allocation28_spill]]  ;;  %s2277_s25 = sld [smem:[#allocation25_spill]] }
 0x30f   : > { %s2278_s16 = sld [smem:[#allocation26_spill]]  ;;  %s2279_s24 = sld [smem:[#allocation27_spill]] }
 0x310   : > { %s2281_s27 = smov %s1540_s28  ;;  %s2283_s30 = smov %s1552_s9 }
 0x311   : > { %s2282_s28 = smov %s2272_s3  ;;  %s2284_s9 = smov %s1556_s10 }
 0x312   : > { %s2286_s11 = smov %s1564_s12  ;;  %s2289_s15 = smov %s1584_s17 }
 0x313   : > { %s2285_s10 = smov %s2274_s23  ;;  %s2287_s12 = smov %s2275_s4 }
 0x314   : > { %s2288_s14 = smov %s2277_s25  ;;  %27 = sbr.rel (!%p2131_p9) target bundleno = 22 (0x16), region = 151 }
 0x315   : > { %s2290_s17 = smov %s2279_s24 }
 0x31b   :  { %828 = vsyncpa [#allocation7], 1 }
 0x31c   :  { %830 = vsyncpa [#allocation7 + $0x1], 1 }
 0x31d   :  { %831 = vsyncpa [#allocation10], 1 }
 0x31e   :  { %833 = vsyncpa [#allocation10 + $0x1], 1 }
 0x31f   :  { %834 = vsyncpa [#allocation13], 1 }
 0x320   :  { %836 = vsyncpa [#allocation13 + $0x1], 1 }
 0x321   :  { %837 = vsyncpa [#allocation8], 1 }
 0x322   :  { %839 = vsyncpa [#allocation8 + $0x1], 1 }

</bundles_post_ra>
